<compile_context>
chip_gen: v6e
topology: v6e:2x2x1
jax: 0.10.0
libtpu: 0.0.40
codegen_flags: <defaults>
</compile_context>

<pallas_src>
import functools
import math

import jax
import jax.numpy as jnp
from jax import lax
from jax.experimental import pallas as pl
from jax.experimental.pallas import tpu as pltpu

_LANE = 128
_NEG_INF_BIAS = -1e9


def _sa_flash_kernel(q_ref, kv_ref, pad_ref, attn_ref, o_ref,
                     m_sc, l_sc, acc_sc, *, scale, compute_dtype):
    # q_ref:   (1, tq, Dp)  query tile
    # kv_ref:  (1, tk, Dp)  key/value tile (same tensor x)
    # pad_ref: (1, 1, tk)   key-padding additive bias (0 / -1e9, bf16)
    # attn_ref:(tq, tk)     attention additive bias   (0 / -1e9, bf16)
    # o_ref:   (1, tq, Dp)  output tile (resident across the key axis)
    ki = pl.program_id(2)

    @pl.when(ki == 0)
    def _init():
        m_sc[...] = jnp.full(m_sc.shape, -jnp.inf, jnp.float32)
        l_sc[...] = jnp.zeros(l_sc.shape, jnp.float32)
        acc_sc[...] = jnp.zeros(acc_sc.shape, jnp.float32)

    # Scale folded into q (tq*Dp mul instead of tq*tk); bf16 MXU operands.
    q = (q_ref[0] * scale).astype(compute_dtype)          # (tq, Dp)
    kv = kv_ref[0].astype(compute_dtype)                   # (tk, Dp)

    # scores = (q/sqrt(D)) @ kv^T  -- contract last dims, f32 accumulation.
    s = lax.dot_general(
        q, kv, dimension_numbers=(((1,), (1,)), ((), ())),
        preferred_element_type=jnp.float32)                 # (tq, tk)

    # Single additive-bias masking (key padding broadcast over queries).
    s = s + pad_ref[0] + attn_ref[...]

    # Online (flash) softmax update.
    m_prev = m_sc[...]
    m_new = jnp.maximum(m_prev, jnp.max(s, axis=-1, keepdims=True))
    alpha = jnp.exp(m_prev - m_new)
    p = jnp.exp(s - m_new)
    l_sc[...] = alpha * l_sc[...] + jnp.sum(p, axis=-1, keepdims=True)
    acc_sc[...] = alpha * acc_sc[...] + lax.dot_general(
        p.astype(compute_dtype), kv,
        dimension_numbers=(((1,), (0,)), ((), ())),
        preferred_element_type=jnp.float32)
    m_sc[...] = m_new

    @pl.when(ki == pl.num_programs(2) - 1)
    def _finalize():
        inv = pl.reciprocal(l_sc[...], approx=True)         # EUP slot, ~free
        o_ref[0] = (acc_sc[...] * inv).astype(o_ref.dtype)


def _choose_tile(s, pref):
    """Largest MXU/lane-friendly tile <= pref that divides s (s % 128 == 0)."""
    for t in (pref, 512, 256, 128):
        if t <= pref and s % t == 0:
            return t
    return s


def _vmem_estimate(tq, tk, dp, itemsize):
    """Double-buffered tiles + f32 scratch, in bytes."""
    tiles = 2 * (tq * dp * itemsize      # q
                 + tk * dp * itemsize    # kv
                 + tk * 2                # pad bias (bf16)
                 + tq * tk * 2           # attn bias (bf16)
                 + tq * dp * itemsize)   # out
    scratch = tq * dp * 4 + 2 * tq * 4   # acc + m + l
    return tiles + scratch


def sa_forward(x, attn_mask, pad_mask):
    """Pallas SA forward (eval mode).

    x:         (B, S, D)
    attn_mask: (S, S) float, 0.0 = masked (broadcast over batch), or None
    pad_mask:  (B, S) or (B, 1, S) float key-padding mask, 0.0 = masked, or None
    """
    B, S, D = x.shape
    out_dtype = x.dtype
    itemsize = jnp.dtype(x.dtype).itemsize
    scale = 1.0 / math.sqrt(D)                       # uses the ORIGINAL d_model
    compute_dtype = jnp.bfloat16 if x.dtype == jnp.float32 else x.dtype

    # ---- masks -> additive biases (0 / -1e9), bf16 to halve the mask HBM stream.
    if pad_mask is not None and pad_mask.ndim == 2:
        pad_mask = pad_mask[:, None, :]
    if pad_mask is None:
        pad_bias = jnp.zeros((B, 1, S), jnp.bfloat16)
    else:
        assert pad_mask.shape == (B, 1, S), "pad_mask must be a (B, S) key mask"
        pad_bias = jnp.where(pad_mask == 0.0, jnp.float32(_NEG_INF_BIAS),
                             0.0).astype(jnp.bfloat16)
    if attn_mask is None:
        attn_bias = jnp.zeros((S, S), jnp.bfloat16)
    else:
        assert attn_mask.shape == (S, S)
        attn_bias = jnp.where(attn_mask == 0.0, jnp.float32(_NEG_INF_BIAS),
                              0.0).astype(jnp.bfloat16)

    # ---- lane-dense last dim: pad D to a multiple of 128 (zero columns do not
    #      change scores; extra output columns are sliced off afterwards).
    Dp = D if D % _LANE == 0 else (D + _LANE - 1) // _LANE * _LANE
    if Dp != D:
        x = jnp.pad(x, ((0, 0), (0, 0), (0, Dp - D)))

    # ---- sequence tiling.  Big tq cuts kv re-streaming; never fall back to a
    #      full-(S,S) mask tile for large, non-128-aligned S (pad S instead).
    if S % _LANE == 0:
        Sp = S
        tq = _choose_tile(Sp, 512)
        tk = _choose_tile(Sp, 256)
    elif S <= 1024:
        Sp, tq, tk = S, S, S          # single full-S tile (block == full dims)
    else:
        Sp = (S + _LANE - 1) // _LANE * _LANE
        x = jnp.pad(x, ((0, 0), (0, Sp - S), (0, 0)))
        attn_bias = jnp.pad(attn_bias, ((0, Sp - S), (0, Sp - S)))
        # Padded keys are excluded for every query via the key-padding bias.
        pad_bias = jnp.pad(pad_bias, ((0, 0), (0, 0), (0, Sp - S)),
                           constant_values=_NEG_INF_BIAS)
        tq = _choose_tile(Sp, 512)
        tk = _choose_tile(Sp, 256)

    # v7x has 2 TensorCores: keep >= 2 units of work on the parallel axes.
    while (B * (Sp // tq) < 2 and tq % 2 == 0 and tq // 2 >= _LANE
           and Sp % (tq // 2) == 0):
        tq //= 2

    # Keep double-buffered tiles + scratch well under v7x's 64 MiB VMEM.
    VMEM_BUDGET = 40 << 20
    while (_vmem_estimate(tq, tk, Dp, itemsize) > VMEM_BUDGET
           and tq >= 256 and Sp % (tq // 2) == 0):
        tq //= 2
    while (_vmem_estimate(tq, tk, Dp, itemsize) > VMEM_BUDGET
           and tk >= 256 and Sp % (tk // 2) == 0):
        tk //= 2

    nq, nk = Sp // tq, Sp // tk
    est = _vmem_estimate(tq, tk, Dp, itemsize)
    vmem_limit = int(min(max(3 * est + (8 << 20), 32 << 20), 56 << 20))

    cost = pl.CostEstimate(
        flops=4 * B * Sp * Sp * Dp,                  # two matmuls
        transcendentals=B * Sp * Sp,                 # exp of scores
        bytes_accessed=int(
            B * Sp * Dp * itemsize                   # q (resident across keys)
            + B * nq * Sp * Dp * itemsize            # kv re-streamed per q tile
            + B * Sp * Sp * 2                        # attn bias (bf16), per batch
            + B * nq * Sp * 2                        # pad bias (bf16)
            + B * Sp * Dp * itemsize),               # output
    )

    kernel = functools.partial(_sa_flash_kernel, scale=scale,
                               compute_dtype=compute_dtype)

    # TODO(synk): if a profile shows exposed DMA at small D, add
    # pipeline_mode=pl.Buffered(3) on the kv / attn-bias BlockSpecs.
    out = pl.pallas_call(
        kernel,
        out_shape=jax.ShapeDtypeStruct((B, Sp, Dp), out_dtype),
        grid_spec=pltpu.PrefetchScalarGridSpec(
            num_scalar_prefetch=0,
            grid=(B, nq, nk),
            in_specs=[
                pl.BlockSpec((1, tq, Dp), lambda b, qi, ki: (b, qi, 0)),  # queries
                pl.BlockSpec((1, tk, Dp), lambda b, qi, ki: (b, ki, 0)),  # keys/vals
                pl.BlockSpec((1, 1, tk), lambda b, qi, ki: (b, 0, ki)),   # pad bias
                pl.BlockSpec((tq, tk), lambda b, qi, ki: (qi, ki)),       # attn bias
            ],
            out_specs=pl.BlockSpec((1, tq, Dp), lambda b, qi, ki: (b, qi, 0)),
            scratch_shapes=[
                pltpu.VMEM((tq, 1), jnp.float32),    # running max m
                pltpu.VMEM((tq, 1), jnp.float32),    # running denom l
                pltpu.VMEM((tq, Dp), jnp.float32),   # output accumulator
            ],
        ),
        compiler_params=pltpu.CompilerParams(
            dimension_semantics=("parallel", "parallel", "arbitrary"),
            vmem_limit_bytes=vmem_limit,
        ),
        cost_estimate=cost,
    )(x, x, pad_bias, attn_bias)

    if Sp != S or Dp != D:
        out = out[:, :S, :D]
    return out


def sa_reference(x, attn_mask, pad_key_mask):
    """Pure-JAX reference mirroring the PyTorch forward (eval mode, f32)."""
    scale = math.sqrt(x.shape[-1])
    scores = jnp.einsum("bqd,bkd->bqk", x, x) / scale
    scores = jnp.where(pad_key_mask[:, None, :] == 0.0, -1e9, scores)
    scores = jnp.where(attn_mask[None, :, :] == 0.0, -1e9, scores)
    prob = jax.nn.softmax(scores, axis=-1)
    return jnp.einsum("bqk,bkd->bqd", prob, x)


if __name__ == "__main__":
    B, S, D = 2, 8, 32
    key = jax.random.PRNGKey(0)
    kx, kp = jax.random.split(key, 2)

    x = jax.random.normal(kx, (B, S, D), dtype=jnp.float32)

    # Key-padding mask: (B, S) float 0/1.  Keep key 0 unmasked so no query row
    # is fully masked (degenerate rows are documented above).
    pad_mask = (jax.random.uniform(kp, (B, S)) > 0.2).astype(jnp.float32)
    pad_mask = pad_mask.at[:, 0].set(1.0)

    # attn_mask: (S, S) causal mask, float 0/1.
    attn_mask = jnp.tril(jnp.ones((S, S), dtype=jnp.float32))

    out = jax.block_until_ready(sa_forward(x, attn_mask, pad_mask))
    ref = sa_reference(x, attn_mask, pad_mask)

    assert out.shape == (B, S, D)
    assert out.dtype == x.dtype
    # bf16 MXU operands (f32 accumulation) -> ~1e-2-level error vs f32 reference.
    assert jnp.allclose(out, ref, atol=5e-2, rtol=5e-2), (
        f"mismatch vs reference, max abs err {jnp.max(jnp.abs(out - ref))}")

    print("KERNEL_OK")
</pallas_src>

<mosaic_0001>
module attributes {stable_mosaic.version = 11 : i64} {
  func.func @_sa_flash_kernel(%arg0: i32, %arg1: i32, %arg2: i32, %arg3: memref<1x8x128xf32, #tpu.memory_space<vmem>>, %arg4: memref<1x8x128xf32, #tpu.memory_space<vmem>>, %arg5: memref<1x1x8xbf16, #tpu.memory_space<vmem>>, %arg6: memref<8x8xbf16, #tpu.memory_space<vmem>>, %arg7: memref<1x8x128xf32, #tpu.memory_space<vmem>>, %arg8: memref<8x1xf32, #tpu.memory_space<vmem>>, %arg9: memref<8x1xf32, #tpu.memory_space<vmem>>, %arg10: memref<8x128xf32, #tpu.memory_space<vmem>>) attributes {dimension_semantics = [#tpu.dimension_semantics<parallel>, #tpu.dimension_semantics<parallel>, #tpu.dimension_semantics<arbitrary>], iteration_bounds = array<i64: 2, 1, 1>, scalar_prefetch = 0 : i64, scratch_operands = 3 : i64, tpu.core_type = #tpu.core_type<tc>, window_params = [{transform_indices = @transform_0, window_bounds = array<i64: 1, 8, 128>}, {transform_indices = @transform_1, window_bounds = array<i64: 1, 8, 128>}, {transform_indices = @transform_2, window_bounds = array<i64: 1, 1, 8>}, {transform_indices = @transform_3, window_bounds = array<i64: 8, 8>}, {transform_indices = @transform_4, window_bounds = array<i64: 1, 8, 128>}]} {
    %c0_i32 = arith.constant 0 : i32
    %0 = arith.cmpi eq, %arg2, %c0_i32 : i32
    %1 = arith.extui %0 : i1 to i32
    %c0_i32_0 = arith.constant 0 : i32
    %2 = arith.cmpi ne, %1, %c0_i32_0 : i32
    scf.if %2 {
      %cst_29 = arith.constant 0xFF800000 : f32
      %46 = vector.broadcast %cst_29 : f32 to vector<8x1xf32>
      %c0_30 = arith.constant 0 : index
      %c0_31 = arith.constant 0 : index
      %47 = vector.load %arg8[%c0_30, %c0_31] : memref<8x1xf32, #tpu.memory_space<vmem>>, vector<8x1xf32>
      tpu.vector_store %arg8[%c0_30, %c0_31], %46 {strides = array<i32>} : memref<8x1xf32, #tpu.memory_space<vmem>>, vector<8x1xf32>,
      %cst_32 = arith.constant 0.000000e+00 : f32
      %48 = vector.broadcast %cst_32 : f32 to vector<8x1xf32>
      %c0_33 = arith.constant 0 : index
      %c0_34 = arith.constant 0 : index
      %49 = vector.load %arg9[%c0_33, %c0_34] : memref<8x1xf32, #tpu.memory_space<vmem>>, vector<8x1xf32>
      tpu.vector_store %arg9[%c0_33, %c0_34], %48 {strides = array<i32>} : memref<8x1xf32, #tpu.memory_space<vmem>>, vector<8x1xf32>,
      %cst_35 = arith.constant 0.000000e+00 : f32
      %50 = vector.broadcast %cst_35 : f32 to vector<8x128xf32>
      %c0_36 = arith.constant 0 : index
      %c0_37 = arith.constant 0 : index
      %51 = vector.load %arg10[%c0_36, %c0_37] : memref<8x128xf32, #tpu.memory_space<vmem>>, vector<8x128xf32>
      tpu.vector_store %arg10[%c0_36, %c0_37], %50 {strides = array<i32>} : memref<8x128xf32, #tpu.memory_space<vmem>>, vector<8x128xf32>,
    } else {
    }
    %c0 = arith.constant 0 : index
    %c0_1 = arith.constant 0 : index
    %c0_2 = arith.constant 0 : index
    %3 = vector.load %arg3[%c0, %c0_1, %c0_2] : memref<1x8x128xf32, #tpu.memory_space<vmem>>, vector<1x8x128xf32>
    %4 = vector.shape_cast %3 : vector<1x8x128xf32> to vector<8x128xf32>
    %cst = arith.constant 0.176776692 : f32
    %5 = vector.broadcast %cst : f32 to vector<8x128xf32>
    %6 = arith.mulf %4, %5 : vector<8x128xf32>
    %7 = arith.truncf %6 : vector<8x128xf32> to vector<8x128xbf16>
    %c0_3 = arith.constant 0 : index
    %c0_4 = arith.constant 0 : index
    %c0_5 = arith.constant 0 : index
    %8 = vector.load %arg4[%c0_3, %c0_4, %c0_5] : memref<1x8x128xf32, #tpu.memory_space<vmem>>, vector<1x8x128xf32>
    %9 = vector.shape_cast %8 : vector<1x8x128xf32> to vector<8x128xf32>
    %10 = arith.truncf %9 : vector<8x128xf32> to vector<8x128xbf16>
    %cst_6 = arith.constant dense<0.000000e+00> : vector<8x8xf32>
    %11 = tpu.matmul %7, %10, %cst_6 {dimension_numbers = #tpu.dot_dimension_numbers<[1], [1], [0], [0], [0, 0, 1, 0], [], []>} : vector<8x128xbf16>, vector<8x128xbf16>, vector<8x8xf32> -> vector<8x8xf32>
    %c0_7 = arith.constant 0 : index
    %c0_8 = arith.constant 0 : index
    %c0_9 = arith.constant 0 : index
    %12 = vector.load %arg5[%c0_7, %c0_8, %c0_9] : memref<1x1x8xbf16, #tpu.memory_space<vmem>>, vector<1x1x8xbf16>
    %13 = vector.shape_cast %12 : vector<1x1x8xbf16> to vector<1x8xbf16>
    %14 = arith.extf %13 : vector<1x8xbf16> to vector<1x8xf32>
    %15 = vector.broadcast %14 : vector<1x8xf32> to vector<8x8xf32>
    %16 = arith.addf %11, %15 : vector<8x8xf32>
    %c0_10 = arith.constant 0 : index
    %c0_11 = arith.constant 0 : index
    %17 = vector.load %arg6[%c0_10, %c0_11] : memref<8x8xbf16, #tpu.memory_space<vmem>>, vector<8x8xbf16>
    %18 = arith.extf %17 : vector<8x8xbf16> to vector<8x8xf32>
    %19 = arith.addf %16, %18 : vector<8x8xf32>
    %c0_12 = arith.constant 0 : index
    %c0_13 = arith.constant 0 : index
    %20 = vector.load %arg8[%c0_12, %c0_13] : memref<8x1xf32, #tpu.memory_space<vmem>>, vector<8x1xf32>
    %cst_14 = arith.constant dense<0xFF800000> : vector<8xf32>
    %21 = vector.multi_reduction <maximumf>, %19, %cst_14 [1] : vector<8x8xf32> to vector<8xf32>
    %22 = vector.shape_cast %21 : vector<8xf32> to vector<8x1xf32>
    %23 = arith.maximumf %20, %22 : vector<8x1xf32>
    %24 = arith.subf %20, %23 : vector<8x1xf32>
    %25 = math.exp %24 : vector<8x1xf32>
    %26 = vector.broadcast %23 : vector<8x1xf32> to vector<8x8xf32>
    %27 = arith.subf %19, %26 : vector<8x8xf32>
    %28 = math.exp %27 : vector<8x8xf32>
    %c0_15 = arith.constant 0 : index
    %c0_16 = arith.constant 0 : index
    %29 = vector.load %arg9[%c0_15, %c0_16] : memref<8x1xf32, #tpu.memory_space<vmem>>, vector<8x1xf32>
    %30 = arith.mulf %25, %29 : vector<8x1xf32>
    %cst_17 = arith.constant dense<0.000000e+00> : vector<8xf32>
    %31 = vector.multi_reduction <add>, %28, %cst_17 [1] : vector<8x8xf32> to vector<8xf32>
    %32 = vector.shape_cast %31 : vector<8xf32> to vector<8x1xf32>
    %33 = arith.addf %30, %32 : vector<8x1xf32>
    %c0_18 = arith.constant 0 : index
    %c0_19 = arith.constant 0 : index
    %34 = vector.load %arg9[%c0_18, %c0_19] : memref<8x1xf32, #tpu.memory_space<vmem>>, vector<8x1xf32>
    tpu.vector_store %arg9[%c0_18, %c0_19], %33 {strides = array<i32>} : memref<8x1xf32, #tpu.memory_space<vmem>>, vector<8x1xf32>,
    %c0_20 = arith.constant 0 : index
    %c0_21 = arith.constant 0 : index
    %35 = vector.load %arg10[%c0_20, %c0_21] : memref<8x128xf32, #tpu.memory_space<vmem>>, vector<8x128xf32>
    %36 = vector.broadcast %25 : vector<8x1xf32> to vector<8x128xf32>
    %37 = arith.mulf %36, %35 : vector<8x128xf32>
    %38 = arith.truncf %28 : vector<8x8xf32> to vector<8x8xbf16>
    %cst_22 = arith.constant dense<0.000000e+00> : vector<8x128xf32>
    %39 = tpu.matmul %38, %10, %cst_22 {dimension_numbers = #tpu.dot_dimension_numbers<[1], [0], [0], [1], [0, 0, 1, 1], [], []>} : vector<8x8xbf16>, vector<8x128xbf16>, vector<8x128xf32> -> vector<8x128xf32>
    %40 = arith.addf %37, %39 : vector<8x128xf32>
    %c0_23 = arith.constant 0 : index
    %c0_24 = arith.constant 0 : index
    %41 = vector.load %arg10[%c0_23, %c0_24] : memref<8x128xf32, #tpu.memory_space<vmem>>, vector<8x128xf32>
    tpu.vector_store %arg10[%c0_23, %c0_24], %40 {strides = array<i32>} : memref<8x128xf32, #tpu.memory_space<vmem>>, vector<8x128xf32>,
    %c0_25 = arith.constant 0 : index
    %c0_26 = arith.constant 0 : index
    %42 = vector.load %arg8[%c0_25, %c0_26] : memref<8x1xf32, #tpu.memory_space<vmem>>, vector<8x1xf32>
    tpu.vector_store %arg8[%c0_25, %c0_26], %23 {strides = array<i32>} : memref<8x1xf32, #tpu.memory_space<vmem>>, vector<8x1xf32>,
    %c0_i32_27 = arith.constant 0 : i32
    %43 = arith.cmpi eq, %arg2, %c0_i32_27 : i32
    %44 = arith.extui %43 : i1 to i32
    %c0_i32_28 = arith.constant 0 : i32
    %45 = arith.cmpi ne, %44, %c0_i32_28 : i32
    scf.if %45 {
      %c0_29 = arith.constant 0 : index
      %c0_30 = arith.constant 0 : index
      %46 = vector.load %arg9[%c0_29, %c0_30] : memref<8x1xf32, #tpu.memory_space<vmem>>, vector<8x1xf32>
      %47 = tpu.reciprocal %46 {approx = true} : vector<8x1xf32> -> vector<8x1xf32>
      %c0_31 = arith.constant 0 : index
      %c0_32 = arith.constant 0 : index
      %48 = vector.load %arg10[%c0_31, %c0_32] : memref<8x128xf32, #tpu.memory_space<vmem>>, vector<8x128xf32>
      %49 = vector.broadcast %47 : vector<8x1xf32> to vector<8x128xf32>
      %50 = arith.mulf %48, %49 : vector<8x128xf32>
      %c0_33 = arith.constant 0 : index
      %c0_34 = arith.constant 0 : index
      %c0_35 = arith.constant 0 : index
      %51 = vector.load %arg7[%c0_33, %c0_34, %c0_35] : memref<1x8x128xf32, #tpu.memory_space<vmem>>, vector<1x8x128xf32>
      %52 = vector.shape_cast %51 : vector<1x8x128xf32> to vector<8x128xf32>
      %53 = vector.shape_cast %50 : vector<8x128xf32> to vector<1x8x128xf32>
      tpu.vector_store %arg7[%c0_33, %c0_34, %c0_35], %53 {strides = array<i32>} : memref<1x8x128xf32, #tpu.memory_space<vmem>>, vector<1x8x128xf32>,
    } else {
    }
    return
  }
  func.func @transform_0(%arg0: i32, %arg1: i32, %arg2: i32) -> (i32, i32, i32) {
    %c0_i32 = arith.constant 0 : i32
    %c0_i32_0 = arith.constant 0 : i32
    return %arg0, %arg1, %c0_i32 : i32, i32, i32
  }
  func.func @transform_1(%arg0: i32, %arg1: i32, %arg2: i32) -> (i32, i32, i32) {
    %c0_i32 = arith.constant 0 : i32
    %c0_i32_0 = arith.constant 0 : i32
    return %arg0, %arg2, %c0_i32 : i32, i32, i32
  }
  func.func @transform_2(%arg0: i32, %arg1: i32, %arg2: i32) -> (i32, i32, i32) {
    %c0_i32 = arith.constant 0 : i32
    %c0_i32_0 = arith.constant 0 : i32
    return %arg0, %c0_i32, %arg2 : i32, i32, i32
  }
  func.func @transform_3(%arg0: i32, %arg1: i32, %arg2: i32) -> (i32, i32) {
    %c0_i32 = arith.constant 0 : i32
    return %arg1, %arg2 : i32, i32
  }
  func.func @transform_4(%arg0: i32, %arg1: i32, %arg2: i32) -> (i32, i32, i32) {
    %c0_i32 = arith.constant 0 : i32
    %c0_i32_0 = arith.constant 0 : i32
    return %arg0, %arg1, %c0_i32 : i32, i32, i32
  }
}

</mosaic_0001>

<bundles_post_ra>
// kernel: tpu_custom_call.1
= control target key start
LH: loop header
LB: loop body
LE: loop exit
PB: predicated region body
PF: predicated region fallthrough
CT: control target
= control target key end

     0   :  { %9 = vsyncpa [#allocation6], 0  ;;  %s1109_s0 = inlined_call_operand.hbm [shape: f32[2,8,128], index: 0, kind: input, shape index: {}]   ;;  %s1110_s1 = inlined_call_operand.hbm [shape: f32[2,8,128], index: 1, kind: input, shape index: {}]   ;;  %s1111_s2 = inlined_call_operand.vmem [shape: bf16[2,1,8], index: 2, kind: input, shape index: {}]   ;;  %s1112_s3 = inlined_call_operand.vmem [shape: bf16[8,8], index: 3, kind: input, shape index: {}]   ;;  %s1113_s4 = inlined_call_operand.hbm [shape: f32[2,8,128], index: 4, kind: output, shape index: {}]  }
   0x1   :  { %11 = vsyncpa [#allocation6 + $0x1], 0 }
   0x2   :  { %12 = vsyncpa [#allocation9], 0 }
   0x3   :  { %14 = vsyncpa [#allocation9 + $0x1], 0 }
   0x4   :  { %15 = vsyncpa [#allocation7], 0 }
   0x5   :  { %17 = vsyncpa [#allocation7 + $0x1], 0  ;;  %s928_s15 = smov 0   ;;  %s930_s16 = smov 0  }
   0x6   :  { %s932_s17 = smov 0   ;;  %s934_s18 = smov 0  }
   0x7   :  { %s936_s19 = smov 0   ;;  %s938_s20 = smov 0  }
   0x8 LB: > { %s641_s21 = sadd.s32 4294967295, %s894_s20   ;;  %s642_s22 = sadd.s32 4294967294, %s894_s20   ;;  %s894_s20 = sphi %s938_s20, %s23_s20   ;;  %s890_s19 = sphi %s936_s19, %s1125_s19   ;;  %s886_s18 = sphi %s934_s18, %s1124_s18   ;;  %s882_s17 = sphi %s932_s17, %s1123_s17   ;;  %s878_s16 = sphi %s930_s16, %s1122_s16   ;;  %s874_s15 = sphi %s928_s15, %s1121_s15  }
   0x9   : > { %s42_s23 = sadd.s32 1, %s890_s19  ;;  %s51_s24 = sadd.s32 1, %s882_s17 }
   0xa   : > { %p44_p0 = scmp.ge.s32.totalorder %s42_s23, 2  ;;  %p58_p1 = scmp.ne.s32.totalorder %s882_s17, %s878_s16 }
   0xb   : > { %p59_p2 = scmp.eq.s32.totalorder %s894_s20, 0  ;;  %p64_p3 = scmp.ne.s32.totalorder %s878_s16, %s874_s15 }
   0xc   : > { %s1127_s23 = smov (%p44_p0, %s42_s23), 0  ;;  %p65_p5 = scmp.eq.s32.totalorder %s641_s21, 0 }
   0xd   : > { %p969_p4 = por %p59_p2, %p58_p1  ;;  %s46_s26 = ssub.s32 %s890_s19, %s1127_s23 }
   0xe   : > { %p174_p6 = scmp.eq.s32.totalorder %s641_s21, 1  ;;  %p49_p7 = scmp.eq.s32.totalorder %s46_s26, 0 }
   0xf   : > { %p975_p8 = por %p65_p5, %p64_p3  ;;  %p180_p10 = scmp.eq.s32.totalorder %s642_s22, 1 }
  0x10   : > { %p979_p9 = por %p174_p6, %p58_p1  ;;  %p692_p13 = scmp.lt.s32.totalorder %s894_s20, 2 }
  0x11   : > { %s984_s29 = scalar_select %p49_p7, %s882_s17, %s51_s24  }
  0x12   : > { %p986_p11 = por %p180_p10, %p64_p3  ;;  %s993_s5 = sand.u32 1, %s882_s17  }
  0x13   : > { %s646_s6 = sshll.u32 %s993_s5, 3  ;;  %s647_s7 = sshll.u32 %s890_s19, 7 }
  0x14   : > { %s220_s10 = scalar_lea.hbm %s1109_s0, %s647_s7  ;;  %s214_s11 = scalar_lea.vmem [#allocation5], %s646_s6 }
  0x15   : > { %s222_s12 = sshll.u32 %s214_s11, 4  ;;  %p1002_p0 = pnand %p692_p13, %p969_p4  ;;  %s223_s12 = int_to_ptr.vmem [resolvable:$true] %s222_s12 }
  0x16   : > { %p650_p1 = scmp.ge.s32.totalorder %s894_s20, 1  ;;  %p255_p2 = scmp.lt.s32.totalorder %s894_s20, 3 }
  0x17   : > { %s211_s14 = scalar_lea.sflag [#allocation6], %s993_s5  ;;  %p756_p3 = pneg %p1002_p0 }
  0x18   : > { %s767_s21 = scalar_lea.vmem %s223_s12, 128  ;;  %s896_s22 = smov [#allocation5]  }
  0x19   : > { %p768_p5 = scmp.ne.s32.totalorder %s223_s12, %s767_s21  ;;  %s772_s24 = sshll.u32 %s896_s22, 4  ;;  %s773_s24 = int_to_ptr.vmem [resolvable:$false] %s772_s24 }
  0x1a   : > { %s774_s25 = scalar_lea.vmem %s773_s24, 256  ;;  %p775_p4 = scmp.lt.s32.totalorder %s223_s12, %s773_s24 }
  0x1b   : > { %p770_p6 = pnand %p768_p5, %p756_p3  ;;  %p776_p10 = scmp.lt.s32.totalorder %s774_s25, %s767_s21 }
  0x1d   : > { %p771_p7 = pneg %p770_p6  ;;  %p777_p13 = por %p776_p10, %p775_p4 }
  0x1f   : > { %p778_p12 = pnand %p777_p13, %p771_p7 }
  0x21   : > { %781 = shalt.err (!%p778_p12)
}
  0x22   : > { %684 = dma.hbm_to_vmem [thread:$0]  (!%p1002_p0), %s220_s10, 128, %s223_s12, %s211_s14  }
  0x23   : > { %p1020_p5 = pnand %p650_p1, %p255_p2  ;;  %s239_s11 = scalar_lea.hbm %s1110_s1, %s647_s7 }
  0x24   : > { %s233_s21 = scalar_lea.vmem [#allocation8], %s646_s6  ;;  %s230_s24 = scalar_lea.sflag [#allocation9], %s993_s5 }
  0x25   : > { %s241_s22 = sshll.u32 %s233_s21, 4  ;;  %s897_s10 = smov [#allocation8]   ;;  %s242_s22 = int_to_ptr.vmem [resolvable:$true] %s241_s22 }
  0x26   : > { %s795_s25 = scalar_lea.vmem %s242_s22, 128  ;;  %s800_s12 = sshll.u32 %s897_s10, 4  ;;  %s801_s12 = int_to_ptr.vmem [resolvable:$false] %s800_s12 }
  0x27   : > { %p796_p12 = scmp.ne.s32.totalorder %s242_s22, %s795_s25  ;;  %s802_s14 = scalar_lea.vmem %s801_s12, 256 }
  0x28   : > { %p803_p1 = scmp.lt.s32.totalorder %s242_s22, %s801_s12  ;;  %p804_p2 = scmp.lt.s32.totalorder %s802_s14, %s795_s25 }
  0x29   : > { %p798_p6 = pnand %p796_p12, %p756_p3 }
  0x2a   : > { %p805_p4 = por %p804_p2, %p803_p1 }
  0x2b   : > { %p799_p7 = pneg %p798_p6 }
  0x2d   : > { %p806_p10 = pnand %p805_p4, %p799_p7 }
  0x2f   : > { %809 = shalt.err (!%p806_p10)
}
  0x30   : > { %687 = dma.hbm_to_vmem [thread:$0]  (!%p1002_p0), %s239_s11, 128, %s242_s22, %s230_s24  }
  0x31   : > { %259 = sbr.rel (%p1020_p5) target bundleno = 849 (0x351), region = 36  ;;  %s1036_s5 = sand.u32 (!%p1020_p5), 1, %s878_s16  }
  0x32   : > { %s1039_s6 = sshll.u32 (!%p1020_p5), %s1036_s5, 3  ;;  %s262_s7 = scalar_lea.sflag (!%p1020_p5), [#allocation6], %s1036_s5 }
  0x33   : > { %s265_s8 = scalar_lea.vmem (!%p1020_p5), [#allocation5], %s1039_s6 }
  0x36   : > { %861 = dma.done.wait (%p975_p8), %s262_s7, 128  }
  0x37   : > { %863 = vsyncadd (%p975_p8), %s262_s7, 4294967168  ;;  %s271_s13 = scalar_lea.sflag [#allocation9], %s1036_s5  ;;  %s274_s26 = scalar_lea.vmem [#allocation8], %s1039_s6 }
  0x38   : > { %865 = dma.done.wait (%p975_p8), %s271_s13, 128  }
  0x39   : > { %867 = vsyncadd (%p975_p8), %s271_s13, 4294967168  ;;  %vm335_vm0 = vcmask 7168   ;;  %v898_v0 = vmov 0.0   ;;  %vm899_vm1 = vmmov 0   ;;  %v342_v1 = vld [vmem:[%s274_s26] sm:$0xff]  ;;  %v339_v2 = vld [vmem:[%s265_s8] sm:$0xff]  ;;  %v346_v7 = vlaneseq }
  0x3a   : > { %337 = vst.msk [vmem:[#allocation3] sm:$0xff] %vm335_vm0, %v898_v0  ;;  %663 = vmatprep.subr.bf16.mxu0 %v898_v0  ;;  %665 = vmatprep.mubr.msk.bf16.mxu0 %vm899_vm1, %v898_v0  ;;  %v343_v3 = vpack.c.bf16 %v342_v1, %v342_v1  ;;  %v340_v4 = vmul.f32 0.17677669, %v339_v2  ;;  %v900_v6 = vmov -inf   ;;  %p317_p8 = scmp.lt.s32.totalorder %s886_s18, 1  ;;  %vm394_vm2 = vcmask 64512  }
  0x3b   : > { %669 = vmatprep.subr.bf16.mxu1 %v898_v0  ;;  %671 = vmatprep.mubr.msk.bf16.mxu1 %vm899_vm1, %v898_v0  ;;  %336 = vst.msk [vmem:[#allocation2] sm:$0xff] %vm335_vm0, %v900_v6  ;;  %v347_v8 = vshrl.u32 %v346_v7, 7  ;;  %v390_v12 = vld [vmem:[%s1112_s3] sm:$0xf]  ;;  %v901_v22 = vmov 0   ;;  %vm429_vm3 = vcmask 1043456  }
  0x3c   : > { %664 = vmatpush3.bf16.xpose.msra.mxu0 %v343_v3  ;;  %v341_v5 = vpack.c.bf16 %v340_v4, %v340_v4  ;;  %s318_s27 = scalar_select %p317_p8, %s886_s18, 1  ;;  %v391_v14 = vunpack.c.l.bf16 %v390_v12  ;;  %746 = vset.pattern.permute.xlu0 %v901_v22  ;;  %v431_v27 = vsel %vm429_vm3, %v343_v3, 0 }
  0x3d   : > { %v348_v11 = vsub.s32 0, %v347_v8  ;;  %747 = vset.pattern.permute.xlu1 %v901_v22  ;;  %670 = vmatpush3.bf16.msra.mxu1 %v431_v27  ;;  %s656_s25 = sshll.u32 %s886_s18, 7  ;;  %s316_s10 = scalar_lea.vmem [#allocation10], %s1039_s6 }
  0x3e   : > { %s322_s21 = scalar_lea.vmem %s1111_s2, %s318_s27  ;;  %s504_s12 = sshll.u32 %s316_s10, 4  ;;  %s505_s12 = int_to_ptr.vmem [resolvable:$true] %s504_s12 }
  0x3f   : > { %v344_v9 = vld [vmem:[%s322_s21] sm:$0x1]  ;;  %s502_s8 = scalar_lea.hbm %s1113_s4, %s656_s25  ;;  %s490_s13 = scalar_lea.sflag [#allocation7], %s1036_s5 }
  0x40   : > { %v345_v10 = vunpack.c.l.bf16 %v344_v9  ;;  %s810_s26 = scalar_lea.vmem %s505_s12, 128  ;;  %s902_s27 = smov [#allocation10]  }
  0x41   : > { %v410_v36 = vld [vmem:[#allocation3] sm:$0xff]  ;;  %p811_p0 = scmp.ne.s32.totalorder %s505_s12, %s810_s26  ;;  %s814_s9 = sshll.u32 %s902_s27, 4  ;;  %s815_s9 = int_to_ptr.vmem [resolvable:$false] %s814_s9 }
  0x42   : > { %v349_v13 = vrot.slane %v345_v10, %v348_v11  ;;  %v393_v23 = vld [vmem:[#allocation2] sm:$0xff]  ;;  %s816_s18 = scalar_lea.vmem %s815_s9, 256  ;;  %p817_p5 = scmp.lt.s32.totalorder %s505_s12, %s815_s9 }
  0x43   : > { %666 = vmatmul.mubr.bf16.vlgmr.msra.gmra.mxu0 %v341_v5  ;;  %p812_p3 = pnand %p811_p0, %p979_p9  ;;  %p818_p12 = scmp.lt.s32.totalorder %s816_s18, %s810_s26 }
  0x45   : > { %p813_p13 = pneg %p812_p3  ;;  %p819_p6 = por %p818_p12, %p817_p5 }
  0x47   : > { %p820_p7 = pnand %p819_p6, %p813_p13 }
 0x103   : > { %v384_v15 = vpop.f32.mrf.mxu0 }
 0x104   : > { %v385_v16 = vadd.f32 %v384_v15, %v349_v13 }
 0x105   : > { %v667_v17 = vpop.f32.mrf.mxu0 }
 0x106   : > { %v392_v18 = vadd.f32 %v391_v14, %v385_v16 }
 0x107   : > { %v387_v19 = vpop.f32.mrf.mxu0 }
 0x108   : > { %v395_v20 = vsel %vm394_vm2, %v392_v18, -inf }
 0x109   : > { %396 = vmax.xlane.f32.xlu0 %v395_v20  ;;  %v668_v21 = vpop.f32.mrf.mxu0 }
 0x192   : > { %v397_v24 = vpop.xlane.xlu0 %396 }
 0x193   : > { %v398_v25 = vmax.f32 %v393_v23, %v397_v24 }
 0x195   : > { %v399_v26 = vsub.f32 %v393_v23, %v398_v25  ;;  %475 = vst.msk [vmem:[#allocation2] sm:$0xff] %vm335_vm0, %v398_v25  ;;  %404 = vperm.xlu0 %746, %v398_v25  }
 0x197   : > { %v400_v32 = vmul.f32 1.442695, %v399_v26 }
 0x210   : > { %v405_v28 = vpop.permute.xlu0 %404 }
 0x211   : > { %v407_v29 = vsub.f32 %v392_v18, %v405_v28 }
 0x213   : > { %v408_v30 = vmul.f32 1.442695, %v407_v29 }
 0x215   : > { %748 = vpow2.f32 %v408_v30 }
 0x216   : > { %750 = vpow2.f32 %v400_v32 }
 0x222   : > { %v749_v31 = vpop.eup %748 }
 0x223   : > { %v412_v33 = vsel %vm394_vm2, %v749_v31, 0.0  ;;  %v425_v34 = vpack.c.bf16 %v749_v31, %v749_v31  ;;  %v751_v35 = vpop.eup %750 }
 0x224   : > { %413 = vadd.xlane.f32.xlu1 %v412_v33  ;;  %v411_v37 = vmul.f32 %v751_v35, %v410_v36 }
 0x225   : > { %672 = vmatmul.mubr.msk.bf16.vlgmr.msra.gmra.mxu1 %vm394_vm2, %v425_v34 }
 0x235   : > { %421 = vperm.xlu1 %747, %v751_v35  }
 0x2ad   : > { %v414_v38 = vpop.xlane.xlu1 %413 }
 0x2ae   : > { %v415_v39 = vadd.f32 %v414_v38, %v411_v37 }
 0x2b0   : > { %417 = vst.msk [vmem:[#allocation3] sm:$0xff] %vm335_vm0, %v415_v39 }
 0x2b1   : > { %v422_v46 = vpop.permute.xlu1 %421 }
 0x2b2   : > { %v424_v47 = vmul.f32 0.0, %v422_v46 }
 0x2b7   : > { %v479_v40 = vld [vmem:[#allocation3] sm:$0xff] }
 0x2b8   : > { %752 = vrcp.f32 %v479_v40 }
 0x2c5   : > { %v753_v41 = vpop.eup %752 }
 0x2c6   : > { %484 = vperm.xlu1 %747, %v753_v41  }
 0x2e5   : > { %v467_v42 = vpop.f32.mrf.mxu1 }
 0x2e6   : > { %v473_v48 = vadd.f32 %v467_v42, %v424_v47 }
 0x2e7   : > { %v673_v43 = vpop.f32.mrf.mxu1 }
 0x2e9   : > { %v470_v44 = vpop.f32.mrf.mxu1 }
 0x2eb   : > { %v674_v45 = vpop.f32.mrf.mxu1 }
 0x341   : > { %v485_v49 = vpop.permute.xlu1 %484 }
 0x342   : > { %v487_v50 = vmul.f32 %v485_v49, %v473_v48 }
 0x344   : > { %488 = vst [vmem:[%s316_s10] sm:$0xff] %v487_v50 }
 0x345   : > { %823 = shalt.err (!%p820_p7)
}
 0x346   : > { %s824_s6 = scalar_lea.hbm %s502_s8, 128  ;;  %s828_s21 = scalar_lea.hbm %s1113_s4, 256 }
 0x347   : > { %p825_p1 = scmp.ne.s32.totalorder %s502_s8, %s824_s6  ;;  %p829_p10 = scmp.lt.s32.totalorder %s502_s8, %s1113_s4 }
 0x348   : > { %p830_p8 = scmp.lt.s32.totalorder %s828_s21, %s824_s6 }
 0x349   : > { %p826_p2 = pnand %p825_p1, %p979_p9 }
 0x34a   : > { %p831_p0 = por %p830_p8, %p829_p10 }
 0x34b   : > { %p827_p4 = pneg %p826_p2 }
 0x34d   : > { %p832_p3 = pnand %p831_p0, %p827_p4 }
 0x34f   : > { %835 = shalt.err (!%p832_p3)
}
 0x350   : > { %679 = dma.vmem_to_hbm [thread:$0]  (%p979_p9), %s505_s12, 128, %s502_s8, %s490_s13  }
 0x351 PF: > { %s516_s25 = sand.u32 1, %s874_s15   ;;  %p1120_p13 = scmp.ge.s32.totalorder %s894_s20, 2 }
 0x352   : > { %s517_s10 = scalar_lea.sflag [#allocation7], %s516_s25 }
 0x353   : > { %p689_p5 = pnand %p1120_p13, %p986_p11 }
 0x355   : > { %p690_p12 = pneg %p689_p5 }
 0x357   : > { %869 = dma.done.wait (%p690_p12), %s517_s10, 128  }
 0x358   : > { %871 = vsyncadd (%p690_p12), %s517_s10, 4294967168  ;;  %s23_s20 = sadd.s32 1, %s894_s20   ;;  %s1121_s15 = smov %s878_s16 }
 0x359   : > { %p20_p6 = scmp.ge.s32.totalorder %s23_s20, 4   ;;  %s1122_s16 = smov %s882_s17 }
 0x35a   : > { %s1123_s17 = smov %s984_s29  ;;  %s1124_s18 = smov %s890_s19 }
 0x35b   : > { %s1125_s19 = smov %s1127_s23  ;;  %22 = sbr.rel (!%p20_p6) target bundleno = 8 (0x8), region = 108 }
 0x360   :  { %522 = vsyncpa [#allocation6], 1 }
 0x361   :  { %524 = vsyncpa [#allocation6 + $0x1], 1 }
 0x362   :  { %525 = vsyncpa [#allocation9], 1 }
 0x363   :  { %527 = vsyncpa [#allocation9 + $0x1], 1 }
 0x364   :  { %528 = vsyncpa [#allocation7], 1 }
 0x365   :  { %530 = vsyncpa [#allocation7 + $0x1], 1 }

</bundles_post_ra>
